<compile_context>
chip_gen: v7x
topology: tpu7x:2x2x1
jax: 0.10.0
libtpu: 0.0.40
codegen_flags: <defaults>
</compile_context>

<pallas_src>
import jax
import jax.numpy as jnp
from jax.experimental import pallas as pl
from jax.experimental.pallas import tpu as pltpu


MAX_TN = 1024                       # row-tile cap
SMALL_PROBLEM_ELEMS = 64 * 1024     # below this, skip the kernel entirely
VMEM_TILE_BUDGET = 8 * 1024 * 1024  # conservative: fits v5e 16 MiB scoped default


def _round_up(x, m):
    return ((x + m - 1) // m) * m


def _sublane(dtype):
    # Minimum second-to-last tile granularity: 8 (f32), 16 (bf16), 32 (int8).
    return max(8, 32 // jnp.dtype(dtype).itemsize)


def _linear_kernel(x_ref, w_ref, b_ref, y_ref):
    """One row-tile of the Linear layer: y = x @ W + b (f32 accumulate on MXU)."""
    y = jnp.dot(x_ref[...], w_ref[...], preferred_element_type=jnp.float32)
    y_ref[...] = (y + b_ref[...]).astype(y_ref.dtype)


def prepare_params(weight, bias):
    """One-time repack of torch-layout params: weight [C, L] -> [L, C], bias -> [1, C]."""
    return weight.T, bias.reshape(1, -1)


def _pick_tile(N, L, C, dtype):
    sub = _sublane(dtype)
    itemsize = jnp.dtype(dtype).itemsize
    # Double-buffered x tile + double-buffered out tile must fit the VMEM budget
    # (the resident [L, C] weight is tiny for small C).
    per_row = 2 * (L + C) * itemsize
    tn = max(sub, (VMEM_TILE_BUDGET // per_row) // sub * sub)
    tn = min(tn, MAX_TN)
    # v7x megacore: ensure the "parallel" grid has >= 2 steps when N allows.
    half = max(_round_up(pl.cdiv(N, 2), sub), sub)
    tn = min(tn, half)
    tn = min(tn, _round_up(N, sub))
    return tn


@jax.jit
def _myattn_logits(x, w_t, b_row):
    """logits = x @ W^T + b.   x: [N, L], w_t: [L, C], b_row: [1, C]."""
    N, L = x.shape
    C = w_t.shape[1]

    # Small-problem fallback: pallas_call fixed overhead dominates at these sizes.
    if N * L < SMALL_PROBLEM_ELEMS:
        y = jnp.dot(x, w_t, preferred_element_type=jnp.float32) + b_row
        return y.astype(x.dtype)

    tn = _pick_tile(N, L, C, x.dtype)
    grid = (pl.cdiv(N, tn),)  # ragged last block handled by Pallas masking

    return pl.pallas_call(
        _linear_kernel,
        out_shape=jax.ShapeDtypeStruct((N, C), x.dtype),
        grid_spec=pltpu.PrefetchScalarGridSpec(
            num_scalar_prefetch=0,
            grid=grid,
            in_specs=[
                pl.BlockSpec((tn, L), lambda i: (i, 0)),  # x row tile (double-buffered)
                pl.BlockSpec((L, C), lambda i: (0, 0)),   # whole weight, VMEM-resident
                pl.BlockSpec((1, C), lambda i: (0, 0)),   # whole bias, VMEM-resident
            ],
            out_specs=pl.BlockSpec((tn, C), lambda i: (i, 0)),  # exact [N, C] output
        ),
        compiler_params=pltpu.CompilerParams(
            dimension_semantics=("parallel",),  # row tiles independent -> megacore shard
        ),
    )(x, w_t, b_row)


def myattn_forward(x, w_t, b_row):
    """x: [N, L]; packed params from prepare_params. Returns (logits, x)."""
    y = _myattn_logits(x, w_t, b_row)
    # The module returns the input unchanged — pass it through in Python,
    # no HBM round trip.
    return y, x


if __name__ == "__main__":
    key = jax.random.PRNGKey(0)

    # ---- Main check: goes through the Pallas kernel (N*L >= threshold),
    #      with a ragged last row-tile (N not a multiple of tn). ----
    N, L, C = 600, 256, 4
    kx, kw, kb = jax.random.split(key, 3)
    x = jax.random.normal(kx, (N, L), dtype=jnp.float32)
    bound = 1.0 / (L ** 0.5)
    weight = jax.random.uniform(kw, (C, L), minval=-bound, maxval=bound, dtype=jnp.float32)
    bias = jax.random.uniform(kb, (C,), minval=-bound, maxval=bound, dtype=jnp.float32)

    w_t, b_row = prepare_params(weight, bias)
    y, x_out = myattn_forward(x, w_t, b_row)
    jax.block_until_ready((y, x_out))

    y_ref = x @ weight.T + bias
    assert y.shape == (N, C), f"bad logits shape {y.shape}"
    assert jnp.allclose(y, y_ref, atol=1e-5, rtol=1e-5), "linear mismatch (kernel path)"
    assert x_out is x, "passthrough must be the original input"

    # ---- Secondary check: tiny problem exercises the XLA fallback path. ----
    N2, L2, C2 = 8, 32, 4
    kx2, kw2, kb2 = jax.random.split(jax.random.PRNGKey(1), 3)
    x2 = jax.random.normal(kx2, (N2, L2), dtype=jnp.float32)
    bound2 = 1.0 / (L2 ** 0.5)
    weight2 = jax.random.uniform(kw2, (C2, L2), minval=-bound2, maxval=bound2, dtype=jnp.float32)
    bias2 = jax.random.uniform(kb2, (C2,), minval=-bound2, maxval=bound2, dtype=jnp.float32)
    w_t2, b_row2 = prepare_params(weight2, bias2)
    y2, _ = myattn_forward(x2, w_t2, b_row2)
    jax.block_until_ready(y2)
    assert jnp.allclose(y2, x2 @ weight2.T + bias2, atol=1e-5, rtol=1e-5), "fallback mismatch"

    print("KERNEL_OK")
</pallas_src>

<mosaic_0001>
module attributes {stable_mosaic.version = 11 : i64} {
  func.func @_linear_kernel(%arg0: i32, %arg1: memref<304x256xf32, #tpu.memory_space<vmem>>, %arg2: memref<256x4xf32, #tpu.memory_space<vmem>>, %arg3: memref<1x4xf32, #tpu.memory_space<vmem>>, %arg4: memref<304x4xf32, #tpu.memory_space<vmem>>) attributes {dimension_semantics = [#tpu.dimension_semantics<parallel>], iteration_bounds = array<i64: 2>, scalar_prefetch = 0 : i64, scratch_operands = 0 : i64, tpu.core_type = #tpu.core_type<tc>, window_params = [{transform_indices = @transform_0, window_bounds = array<i64: 304, 256>}, {pipeline_mode = #tpu.pipeline_mode<synchronous>, transform_indices = @transform_1, window_bounds = array<i64: 256, 4>}, {pipeline_mode = #tpu.pipeline_mode<synchronous>, transform_indices = @transform_2, window_bounds = array<i64: 1, 4>}, {transform_indices = @transform_3, window_bounds = array<i64: 304, 4>}]} {
    %c0 = arith.constant 0 : index
    %c0_0 = arith.constant 0 : index
    %0 = vector.load %arg1[%c0, %c0_0] : memref<304x256xf32, #tpu.memory_space<vmem>>, vector<304x256xf32>
    %c0_1 = arith.constant 0 : index
    %c0_2 = arith.constant 0 : index
    %1 = vector.load %arg2[%c0_1, %c0_2] : memref<256x4xf32, #tpu.memory_space<vmem>>, vector<256x4xf32>
    %cst = arith.constant dense<0.000000e+00> : vector<304x4xf32>
    %2 = tpu.matmul %0, %1, %cst {dimension_numbers = #tpu.dot_dimension_numbers<[1], [0], [0], [1], [0, 0, 1, 1], [], []>} : vector<304x256xf32>, vector<256x4xf32>, vector<304x4xf32> -> vector<304x4xf32>
    %c0_3 = arith.constant 0 : index
    %c0_4 = arith.constant 0 : index
    %3 = vector.load %arg3[%c0_3, %c0_4] : memref<1x4xf32, #tpu.memory_space<vmem>>, vector<1x4xf32>
    %4 = vector.broadcast %3 : vector<1x4xf32> to vector<304x4xf32>
    %5 = arith.addf %2, %4 : vector<304x4xf32>
    %c0_5 = arith.constant 0 : index
    %c0_6 = arith.constant 0 : index
    %6 = vector.load %arg4[%c0_5, %c0_6] : memref<304x4xf32, #tpu.memory_space<vmem>>, vector<304x4xf32>
    tpu.vector_store %arg4[%c0_5, %c0_6], %5 {strides = array<i32>} : memref<304x4xf32, #tpu.memory_space<vmem>>, vector<304x4xf32>,
    return
  }
  func.func @transform_0(%arg0: i32) -> (i32, i32) {
    %c0_i32 = arith.constant 0 : i32
    %c0_i32_0 = arith.constant 0 : i32
    return %arg0, %c0_i32 : i32, i32
  }
  func.func @transform_1(%arg0: i32) -> (i32, i32) {
    %c0_i32 = arith.constant 0 : i32
    %c0_i32_0 = arith.constant 0 : i32
    %c0_i32_1 = arith.constant 0 : i32
    return %c0_i32, %c0_i32_0 : i32, i32
  }
  func.func @transform_2(%arg0: i32) -> (i32, i32) {
    %c0_i32 = arith.constant 0 : i32
    %c0_i32_0 = arith.constant 0 : i32
    %c0_i32_1 = arith.constant 0 : i32
    return %c0_i32, %c0_i32_0 : i32, i32
  }
  func.func @transform_3(%arg0: i32) -> (i32, i32) {
    %c0_i32 = arith.constant 0 : i32
    %c0_i32_0 = arith.constant 0 : i32
    return %arg0, %c0_i32 : i32, i32
  }
}

</mosaic_0001>

<bundles_post_ra>
// kernel: _myattn_logits.1
= control target key start
LH: loop header
LB: loop body
LE: loop exit
PB: predicated region body
PF: predicated region fallthrough
CT: control target
= control target key end

     0   :  { %8 = vsyncpa [#allocation3], 0  ;;  %s1936_s0 = inlined_call_operand.hbm [shape: f32[600,256], index: 0, kind: input, shape index: {}]   ;;  %s1937_s1 = inlined_call_operand.vmem [shape: f32[256,4], index: 1, kind: input, shape index: {}]   ;;  %s1938_s2 = inlined_call_operand.vmem [shape: f32[1,4], index: 2, kind: input, shape index: {}]   ;;  %s1939_s3 = inlined_call_operand.vmem [shape: f32[600,4], index: 3, kind: output, shape index: {}]  }
   0x1   :  { %10 = vsyncpa [#allocation3 + $0x1], 0  ;;  %s1358_s12 = smov 0   ;;  %s1360_s13 = smov 0  }
   0x2   :  { %s1362_s14 = smov 0   ;;  %s1364_s15 = smov 0  }
   0x3 LB: > { %s1377_s16 = sadd.s32 4294967295, %s1300_s15   ;;  %s1380_s17 = sadd.s32 1, %s1300_s15   ;;  %s1300_s15 = sphi %s1364_s15, %s1950_s15   ;;  %s1296_s14 = sphi %s1362_s14, %s1949_s14   ;;  %s1292_s13 = sphi %s1360_s13, %s1948_s13   ;;  %s1288_s12 = sphi %s1358_s12, %s1947_s12  }
   0x4   : > { %s20_s18 = ssub.s32 %s1300_s15, %s1380_s17  ;;  %s23_s19 = sadd.s32 1, %s1296_s14 }
   0x5   : > { %p21_p0 = scmp.eq.s32.totalorder %s20_s18, 0  ;;  %p30_p1 = scmp.ne.s32.totalorder %s1296_s14, %s1292_s13 }
   0x6   : > { %p31_p2 = scmp.eq.s32.totalorder %s1300_s15, 0  ;;  %p36_p3 = scmp.ne.s32.totalorder %s1292_s13, %s1288_s12 }
   0x7   : > { %s1390_s20 = scalar_select %p21_p0, %s1296_s14, %s23_s19  }
   0x8   : > { %p32_p4 = por %p31_p2, %p30_p1  ;;  %p37_p5 = scmp.eq.s32.totalorder %s1377_s16, 0 }
   0x9   : > { %p102_p6 = scmp.eq.s32.totalorder %s1377_s16, 1  ;;  %p991_p9 = scmp.ge.s32.totalorder %s1300_s15, 2 }
   0xa   : > { %p1394_p7 = por %p37_p5, %p36_p3 }
   0xb   : > { %p1398_p8 = por %p102_p6, %p30_p1  ;;  %130 = sbr.rel (%p991_p9) target bundleno = 53 (0x35), region = 24 }
  0x12   : > { %133 = sbr.rel (!%p32_p4) target bundleno = 53 (0x35), region = 28  ;;  %s134_s23 = sand.u32 (%p32_p4), 1, %s1296_s14  }
  0x13   : > { %s139_s24 = smul.u32 (%p32_p4), 38, %s1300_s15  ;;  %s1408_s29 = scalar_lea.sflag (%p32_p4), [#allocation3], %s134_s23 }
  0x14   : > { %s1098_s25 = smul.u32 (%p32_p4), 608, %s134_s23 }
  0x15   : > { %s140_s26 = ssub.s32 (%p32_p4), 75, %s139_s24 }
  0x16   : > { %p141_p10 = scmp.lt.s32.totalorder (%p32_p4), %s140_s26, 38  ;;  %s138_s30 = scalar_lea.vmem (%p32_p4), [#allocation2], %s1098_s25 }
  0x19   : > { %s1952_s26 = smov (!%p141_p10, %s140_s26), 38 }
  0x1a   : > { %s1405_s27 = sshll.u32 %s1952_s26, 8 }
  0x1b   : > { %s146_s28 = ssub.s32 9728, %s1405_s27 }
  0x1c   : > { %147 = vsyncadd %s1408_s29, %s146_s28  ;;  %p994_p11 = scmp.ne.s32.totalorder %s1405_s27, 0  ;;  %s1017_s4 = smul.u32 9728, %s1300_s15 }
  0x1d   : > { %s153_s5 = sshll.u32 %s138_s30, 4  ;;  %s1210_s12 = scalar_lea.hbm %s1936_s0, 19200  ;;  %s1418_s5 = int_to_ptr.vmem [resolvable:$true] %s153_s5 }
  0x1e   : > { %s1416_s8 = scalar_lea.hbm %s1936_s0, %s1017_s4 }
  0x1f   : > { %s1206_s9 = scalar_lea.hbm %s1416_s8, %s1405_s27  ;;  %p1211_p1 = scmp.lt.u32.totalorder %s1416_s8, %s1936_s0 }
  0x20   : > { %p1207_p12 = scmp.ne.s32.totalorder %s1416_s8, %s1206_s9  ;;  %p1212_p2 = scmp.lt.u32.totalorder %s1210_s12, %s1206_s9 }
  0x21   : > { %p1214_p4 = scmp.lt.u32.totalorder %s1206_s9, %s1416_s8 }
  0x22   : > { %p1208_p13 = pnand %p1207_p12, %p994_p11  ;;  %p1213_p3 = por %p1212_p2, %p1211_p1 }
  0x24   : > { %p1209_p0 = pneg %p1208_p13  ;;  %p1215_p5 = por %p1214_p4, %p1213_p3 }
  0x26   : > { %p1216_p6 = pnand %p1215_p5, %p1209_p0 }
  0x28   : > { %1219 = shalt.err (!%p1216_p6)
}
  0x29   : > { %s1220_s23 = scalar_lea.vmem %s1418_s5, %s1405_s27  ;;  %s1334_s24 = smov [#allocation2]  }
  0x2a   : > { %p1221_p9 = scmp.ne.s32.totalorder %s1418_s5, %s1220_s23  ;;  %s1224_s25 = sshll.u32 %s1334_s24, 4  ;;  %s1225_s25 = int_to_ptr.vmem [resolvable:$false] %s1224_s25 }
  0x2b   : > { %s1226_s26 = scalar_lea.vmem %s1225_s25, 19456  ;;  %p1227_p13 = scmp.lt.s32.totalorder %s1418_s5, %s1225_s25 }
  0x2c   : > { %p1222_p10 = pnand %p1221_p9, %p994_p11  ;;  %p1228_p1 = scmp.lt.s32.totalorder %s1226_s26, %s1220_s23 }
  0x2e   : > { %p1223_p12 = pneg %p1222_p10  ;;  %p1229_p2 = por %p1228_p1, %p1227_p13 }
  0x30   : > { %p1230_p3 = pnand %p1229_p2, %p1223_p12 }
  0x32   : > { %1233 = shalt.err (!%p1230_p3)
}
  0x33   : > { %s1335_s28 = smov 256   ;;  %s1336_s30 = smov 16  }
  0x34   : > { %159 = dma.hbm_to_vmem [thread:$0]  (%p994_p11), %s1416_s8, %s1405_s27, %s1418_s5, %s1408_s29, %s1335_s28, %s1335_s28, %s1336_s30  }
  0x35 PF: > { %p999_p0 = scmp.ge.s32.totalorder %s1300_s15, 1  ;;  %p161_p4 = scmp.lt.s32.totalorder %s1300_s15, 3 }
  0x37   : > { %p162_p5 = pnand %p999_p0, %p161_p4 }
  0x38   : > { %s1448_s4 = sand.u32 (!%p162_p5), 1, %s1292_s13  }
  0x39   : > { %165 = sbr.rel (%p162_p5) target bundleno = 489 (0x1e9), region = 32  ;;  %s168_s7 = scalar_lea.sflag (!%p162_p5), [#allocation3], %s1448_s4 }
  0x3a   : > { %s1099_s6 = smul.u32 (!%p162_p5), 608, %s1448_s4 }
  0x3c   : > { %s1452_s9 = scalar_lea.vmem (!%p162_p5), [#allocation2], %s1099_s6 }
  0x40   : > { %1283 = dma.done.wait (%p1394_p7), %s168_s7, 9728  }
  0x41   : > { %1285 = vsyncadd (%p1394_p7), %s168_s7, 4294957568  ;;  %v1337_v0 = vmov 0.0|0.0   ;;  %v280_v1 = vld [vmem:[%s1937_s1] sm:$0xff]  ;;  %v281_v2 = vld [vmem:[%s1937_s1 + $0x8] sm:$0xff]  ;;  %s1100_s11 = smul.u32 304, %s1448_s4  ;;  %vm574_vm0 = vcmask 31744  }
  0x42   : > { %1018 = vmatprep.subr.bf16.mxu0 %v1337_v0  ;;  %1066 = vmatprep.subr.bf16.mxu1 %v1337_v0  ;;  %v282_v3 = vld [vmem:[%s1937_s1 + $0x10] sm:$0xff]  ;;  %v1019_v4 = vpack.c.bf16 %v281_v2, %v280_v1  ;;  %v283_v5 = vld [vmem:[%s1937_s1 + $0x18] sm:$0xff]  ;;  %v284_v7 = vld [vmem:[%s1937_s1 + $0x20] sm:$0xff]  ;;  %s620_s4 = smul.u32 (%p1398_p8), 38, %s1377_s16 }
  0x43   : > { %v1022_v6 = vpack.c.bf16 %v283_v5, %v282_v3  ;;  %v285_v8 = vld [vmem:[%s1937_s1 + $0x28] sm:$0xff]  ;;  %v286_v10 = vld [vmem:[%s1937_s1 + $0x30] sm:$0xff]  ;;  %v287_v11 = vld [vmem:[%s1937_s1 + $0x38] sm:$0xff]  ;;  %s1670_s19 = scalar_lea.vmem [#allocation4], %s1100_s11  }
  0x44   : > { %1020 = vmatpush1.bf16.msra.mxu0 %v1019_v4  ;;  %1082 = vmatpush1.bf16.msra.mxu1 %v1019_v4  ;;  %v1025_v9 = vpack.c.bf16 %v285_v8, %v284_v7  ;;  %v205_v12 = vld [vmem:[%s1452_s9 + $0x8] sm:$0xff]  ;;  %v1028_v13 = vpack.c.bf16 %v287_v11, %v286_v10  ;;  %v243_v14 = vld [vmem:[%s1452_s9 + $0x138] sm:$0xff]  ;;  %v288_v15 = vld [vmem:[%s1937_s1 + $0x40] sm:$0xff]  ;;  %s621_s23 = ssub.s32 (%p1398_p8), 75, %s620_s4 }
  0x45   : > { %1021 = vmatprep.subr.bf16.mxu0 %v1337_v0  ;;  %1067 = vmatprep.subr.bf16.mxu1 %v1337_v0  ;;  %v289_v16 = vld [vmem:[%s1937_s1 + $0x48] sm:$0xff]  ;;  %v290_v18 = vld [vmem:[%s1937_s1 + $0x50] sm:$0xff]  ;;  %v291_v19 = vld [vmem:[%s1937_s1 + $0x58] sm:$0xff]  ;;  %p622_p7 = scmp.lt.s32.totalorder (%p1398_p8), %s621_s23, 38 }
  0x46   : > { %383 = vmatprep.mubr.f32.mxu0 %v205_v12  ;;  %478 = vmatprep.mubr.f32.mxu1 %v243_v14  ;;  %v1031_v17 = vpack.c.bf16 %v289_v16, %v288_v15  ;;  %v1034_v20 = vpack.c.bf16 %v291_v19, %v290_v18  ;;  %v292_v21 = vld [vmem:[%s1937_s1 + $0x60] sm:$0xff]  ;;  %v293_v22 = vld [vmem:[%s1937_s1 + $0x68] sm:$0xff]  ;;  %v294_v24 = vld [vmem:[%s1937_s1 + $0x70] sm:$0xff] }
  0x47   : > { %v1037_v23 = vpack.c.bf16 %v293_v22, %v292_v21  ;;  %v295_v25 = vld [vmem:[%s1937_s1 + $0x78] sm:$0xff]  ;;  %v296_v27 = vld [vmem:[%s1937_s1 + $0x80] sm:$0xff]  ;;  %v297_v28 = vld [vmem:[%s1937_s1 + $0x88] sm:$0xff] }
  0x48   : > { %1023 = vmatpush1.bf16.msra.mxu0 %v1022_v6  ;;  %1083 = vmatpush1.bf16.msra.mxu1 %v1022_v6  ;;  %v1040_v26 = vpack.c.bf16 %v295_v25, %v294_v24  ;;  %v1043_v29 = vpack.c.bf16 %v297_v28, %v296_v27  ;;  %v298_v30 = vld [vmem:[%s1937_s1 + $0x90] sm:$0xff]  ;;  %v299_v31 = vld [vmem:[%s1937_s1 + $0x98] sm:$0xff]  ;;  %v300_v33 = vld [vmem:[%s1937_s1 + $0xa0] sm:$0xff] }
  0x49   : > { %1024 = vmatprep.subr.bf16.mxu0 %v1337_v0  ;;  %1068 = vmatprep.subr.bf16.mxu1 %v1337_v0  ;;  %v1046_v32 = vpack.c.bf16 %v299_v31, %v298_v30  ;;  %v301_v34 = vld [vmem:[%s1937_s1 + $0xa8] sm:$0xff]  ;;  %v302_v36 = vld [vmem:[%s1937_s1 + $0xb0] sm:$0xff]  ;;  %v303_v37 = vld [vmem:[%s1937_s1 + $0xb8] sm:$0xff] }
  0x4a   : > { %v1049_v35 = vpack.c.bf16 %v301_v34, %v300_v33  ;;  %v1052_v38 = vpack.c.bf16 %v303_v37, %v302_v36  ;;  %v304_v39 = vld [vmem:[%s1937_s1 + $0xc0] sm:$0xff]  ;;  %v305_v40 = vld [vmem:[%s1937_s1 + $0xc8] sm:$0xff]  ;;  %v306_v42 = vld [vmem:[%s1937_s1 + $0xd0] sm:$0xff] }
  0x4b   : > { %v1055_v41 = vpack.c.bf16 %v305_v40, %v304_v39  ;;  %v307_v43 = vld [vmem:[%s1937_s1 + $0xd8] sm:$0xff]  ;;  %v308_v45 = vld [vmem:[%s1937_s1 + $0xe0] sm:$0xff]  ;;  %v309_v46 = vld [vmem:[%s1937_s1 + $0xe8] sm:$0xff] }
  0x4c   : > { %1026 = vmatpush1.bf16.msra.mxu0 %v1025_v9  ;;  %1084 = vmatpush1.bf16.msra.mxu1 %v1025_v9  ;;  %v1058_v44 = vpack.c.bf16 %v307_v43, %v306_v42  ;;  %v1061_v47 = vpack.c.bf16 %v309_v46, %v308_v45  ;;  %v310_v48 = vld [vmem:[%s1937_s1 + $0xf0] sm:$0xff]  ;;  %v311_v49 = vld [vmem:[%s1937_s1 + $0xf8] sm:$0xff]  ;;  %v204_v51 = vld [vmem:[%s1452_s9] sm:$0xff] }
  0x4d   : > { %1027 = vmatprep.subr.bf16.mxu0 %v1337_v0  ;;  %1069 = vmatprep.subr.bf16.mxu1 %v1337_v0  ;;  %v1064_v50 = vpack.c.bf16 %v311_v49, %v310_v48  ;;  %v242_v52 = vld [vmem:[%s1452_s9 + $0x130] sm:$0xff]  ;;  %v207_v53 = vld [vmem:[%s1452_s9 + $0x18] sm:$0xff]  ;;  %v245_v54 = vld [vmem:[%s1452_s9 + $0x148] sm:$0xff] }
  0x4e   : > { %v206_v55 = vld [vmem:[%s1452_s9 + $0x10] sm:$0xff]  ;;  %v244_v56 = vld [vmem:[%s1452_s9 + $0x140] sm:$0xff]  ;;  %v209_v57 = vld [vmem:[%s1452_s9 + $0x28] sm:$0xff] }
  0x4f   : > { %v247_v58 = vld [vmem:[%s1452_s9 + $0x158] sm:$0xff]  ;;  %v208_v59 = vld [vmem:[%s1452_s9 + $0x20] sm:$0xff]  ;;  %v246_v60 = vld [vmem:[%s1452_s9 + $0x150] sm:$0xff] }
  0x50   : > { %1029 = vmatpush1.bf16.msra.mxu0 %v1028_v13  ;;  %1085 = vmatpush1.bf16.msra.mxu1 %v1028_v13  ;;  %v211_v61 = vld [vmem:[%s1452_s9 + $0x38] sm:$0xff]  ;;  %v249_v62 = vld [vmem:[%s1452_s9 + $0x168] sm:$0xff]  ;;  %v210_v63 = vld [vmem:[%s1452_s9 + $0x30] sm:$0xff] }
  0x51   : > { %1030 = vmatprep.subr.bf16.mxu0 %v1337_v0  ;;  %1070 = vmatprep.subr.bf16.mxu1 %v1337_v0  ;;  %v213_v1 = vld [vmem:[%s1452_s9 + $0x48] sm:$0xff]  ;;  %v251_v2 = vld [vmem:[%s1452_s9 + $0x178] sm:$0xff]  ;;  %v212_v3 = vld [vmem:[%s1452_s9 + $0x40] sm:$0xff] }
  0x52   : > { %v250_v4 = vld [vmem:[%s1452_s9 + $0x170] sm:$0xff]  ;;  %v215_v5 = vld [vmem:[%s1452_s9 + $0x58] sm:$0xff]  ;;  %v253_v6 = vld [vmem:[%s1452_s9 + $0x188] sm:$0xff] }
  0x53   : > { %v214_v7 = vld [vmem:[%s1452_s9 + $0x50] sm:$0xff]  ;;  %v252_v8 = vld [vmem:[%s1452_s9 + $0x180] sm:$0xff]  ;;  %v217_v9 = vld [vmem:[%s1452_s9 + $0x68] sm:$0xff] }
  0x54   : > { %1032 = vmatpush1.bf16.msra.mxu0 %v1031_v17  ;;  %1086 = vmatpush1.bf16.msra.mxu1 %v1031_v17  ;;  %v255_v10 = vld [vmem:[%s1452_s9 + $0x198] sm:$0xff]  ;;  %v216_v11 = vld [vmem:[%s1452_s9 + $0x60] sm:$0xff]  ;;  %v254_v12 = vld [vmem:[%s1452_s9 + $0x190] sm:$0xff] }
  0x55   : > { %1033 = vmatprep.subr.bf16.mxu0 %v1337_v0  ;;  %1071 = vmatprep.subr.bf16.mxu1 %v1337_v0  ;;  %v219_v13 = vld [vmem:[%s1452_s9 + $0x78] sm:$0xff]  ;;  %v257_v14 = vld [vmem:[%s1452_s9 + $0x1a8] sm:$0xff]  ;;  %v218_v15 = vld [vmem:[%s1452_s9 + $0x70] sm:$0xff] }
  0x56   : > { %v256_v16 = vld [vmem:[%s1452_s9 + $0x1a0] sm:$0xff]  ;;  %v221_v17 = vld [vmem:[%s1452_s9 + $0x88] sm:$0xff]  ;;  %v259_v18 = vld [vmem:[%s1452_s9 + $0x1b8] sm:$0xff] }
  0x57   : > { %v220_v19 = vld [vmem:[%s1452_s9 + $0x80] sm:$0xff]  ;;  %v223_v21 = vld [vmem:[%s1452_s9 + $0x98] sm:$0xff]  ;;  %v261_v22 = vld [vmem:[%s1452_s9 + $0x1c8] sm:$0xff] }
  0x58   : > { %1035 = vmatpush1.bf16.msra.mxu0 %v1034_v20  ;;  %1087 = vmatpush1.bf16.msra.mxu1 %v1034_v20  ;;  %v258_v20 = vld [vmem:[%s1452_s9 + $0x1b0] sm:$0xff]  ;;  %v260_v24 = vld [vmem:[%s1452_s9 + $0x1c0] sm:$0xff]  ;;  %v225_v25 = vld [vmem:[%s1452_s9 + $0xa8] sm:$0xff] }
  0x59   : > { %1036 = vmatprep.subr.bf16.mxu0 %v1337_v0  ;;  %1072 = vmatprep.subr.bf16.mxu1 %v1337_v0  ;;  %v224_v27 = vld [vmem:[%s1452_s9 + $0xa0] sm:$0xff]  ;;  %v262_v28 = vld [vmem:[%s1452_s9 + $0x1d0] sm:$0xff]  ;;  %v265_v30 = vld [vmem:[%s1452_s9 + $0x1e8] sm:$0xff] }
  0x5a   : > { %v226_v31 = vld [vmem:[%s1452_s9 + $0xb0] sm:$0xff]  ;;  %v229_v33 = vld [vmem:[%s1452_s9 + $0xc8] sm:$0xff]  ;;  %v267_v34 = vld [vmem:[%s1452_s9 + $0x1f8] sm:$0xff] }
  0x5b   : > { %v266_v36 = vld [vmem:[%s1452_s9 + $0x1f0] sm:$0xff]  ;;  %v231_v37 = vld [vmem:[%s1452_s9 + $0xd8] sm:$0xff]  ;;  %v268_v40 = vld [vmem:[%s1452_s9 + $0x200] sm:$0xff] }
  0x5c   : > { %1038 = vmatpush1.bf16.msra.mxu0 %v1037_v23  ;;  %1088 = vmatpush1.bf16.msra.mxu1 %v1037_v23  ;;  %v222_v23 = vld [vmem:[%s1452_s9 + $0x90] sm:$0xff]  ;;  %v271_v42 = vld [vmem:[%s1452_s9 + $0x218] sm:$0xff]  ;;  %v232_v43 = vld [vmem:[%s1452_s9 + $0xe0] sm:$0xff] }
  0x5d   : > { %1039 = vmatprep.subr.bf16.mxu0 %v1337_v0  ;;  %1073 = vmatprep.subr.bf16.mxu1 %v1337_v0  ;;  %v230_v39 = vld [vmem:[%s1452_s9 + $0xd0] sm:$0xff]  ;;  %v235_v45 = vld [vmem:[%s1452_s9 + $0xf8] sm:$0xff]  ;;  %v273_v46 = vld [vmem:[%s1452_s9 + $0x228] sm:$0xff] }
  0x5e   : > { %v272_v48 = vld [vmem:[%s1452_s9 + $0x220] sm:$0xff]  ;;  %v237_v49 = vld [vmem:[%s1452_s9 + $0x108] sm:$0xff] }
  0x60   : > { %1041 = vmatpush1.bf16.msra.mxu0 %v1040_v26  ;;  %1089 = vmatpush1.bf16.msra.mxu1 %v1040_v26  ;;  %v263_v26 = vld [vmem:[%s1452_s9 + $0x1d8] sm:$0xff] }
  0x61   : > { %1042 = vmatprep.subr.bf16.mxu0 %v1337_v0  ;;  %1074 = vmatprep.subr.bf16.mxu1 %v1337_v0 }
  0x64   : > { %1044 = vmatpush1.bf16.msra.mxu0 %v1043_v29  ;;  %1090 = vmatpush1.bf16.msra.mxu1 %v1043_v29  ;;  %v227_v29 = vld [vmem:[%s1452_s9 + $0xb8] sm:$0xff] }
  0x65   : > { %1045 = vmatprep.subr.bf16.mxu0 %v1337_v0  ;;  %1075 = vmatprep.subr.bf16.mxu1 %v1337_v0 }
  0x68   : > { %1047 = vmatpush1.bf16.msra.mxu0 %v1046_v32  ;;  %1091 = vmatpush1.bf16.msra.mxu1 %v1046_v32  ;;  %v264_v32 = vld [vmem:[%s1452_s9 + $0x1e0] sm:$0xff] }
  0x69   : > { %1048 = vmatprep.subr.bf16.mxu0 %v1337_v0  ;;  %1076 = vmatprep.subr.bf16.mxu1 %v1337_v0 }
  0x6c   : > { %1050 = vmatpush1.bf16.msra.mxu0 %v1049_v35  ;;  %1092 = vmatpush1.bf16.msra.mxu1 %v1049_v35  ;;  %v228_v35 = vld [vmem:[%s1452_s9 + $0xc0] sm:$0xff] }
  0x6d   : > { %1051 = vmatprep.subr.bf16.mxu0 %v1337_v0  ;;  %1077 = vmatprep.subr.bf16.mxu1 %v1337_v0 }
  0x70   : > { %1053 = vmatpush1.bf16.msra.mxu0 %v1052_v38  ;;  %1093 = vmatpush1.bf16.msra.mxu1 %v1052_v38  ;;  %v269_v38 = vld [vmem:[%s1452_s9 + $0x208] sm:$0xff] }
  0x71   : > { %1054 = vmatprep.subr.bf16.mxu0 %v1337_v0  ;;  %1078 = vmatprep.subr.bf16.mxu1 %v1337_v0 }
  0x74   : > { %1056 = vmatpush1.bf16.msra.mxu0 %v1055_v41  ;;  %1094 = vmatpush1.bf16.msra.mxu1 %v1055_v41  ;;  %v233_v41 = vld [vmem:[%s1452_s9 + $0xe8] sm:$0xff] }
  0x75   : > { %1057 = vmatprep.subr.bf16.mxu0 %v1337_v0  ;;  %1079 = vmatprep.subr.bf16.mxu1 %v1337_v0 }
  0x78   : > { %1059 = vmatpush1.bf16.msra.mxu0 %v1058_v44  ;;  %1095 = vmatpush1.bf16.msra.mxu1 %v1058_v44  ;;  %v270_v44 = vld [vmem:[%s1452_s9 + $0x210] sm:$0xff] }
  0x79   : > { %1060 = vmatprep.subr.bf16.mxu0 %v1337_v0  ;;  %1080 = vmatprep.subr.bf16.mxu1 %v1337_v0 }
  0x7c   : > { %1062 = vmatpush1.bf16.msra.mxu0 %v1061_v47  ;;  %1096 = vmatpush1.bf16.msra.mxu1 %v1061_v47  ;;  %v234_v47 = vld [vmem:[%s1452_s9 + $0xf0] sm:$0xff] }
  0x7d   : > { %1063 = vmatprep.subr.bf16.mxu0 %v1337_v0  ;;  %1081 = vmatprep.subr.bf16.mxu1 %v1337_v0  ;;  %v248_v0 = vld [vmem:[%s1452_s9 + $0x160] sm:$0xff] }
  0x80   : > { %1065 = vmatpush1.bf16.msra.mxu0 %v1064_v50  ;;  %1097 = vmatpush1.bf16.msra.mxu1 %v1064_v50  ;;  %v275_v50 = vld [vmem:[%s1452_s9 + $0x238] sm:$0xff] }
  0x83   : > { %384 = vmatmul.mubr.f32.vlgmr.msra.gmra.mrb[0].mxu0 %v204_v51  ;;  %479 = vmatmul.mubr.f32.vlgmr.msra.gmra.mrb[0].mxu1 %v242_v52  ;;  %v236_v51 = vld [vmem:[%s1452_s9 + $0x100] sm:$0xff]  ;;  %v274_v52 = vld [vmem:[%s1452_s9 + $0x230] sm:$0xff] }
  0x84   : > { %388 = vmatprep.mubr.f32.mxu0 %v207_v53  ;;  %483 = vmatprep.mubr.f32.mxu1 %v245_v54  ;;  %v239_v53 = vld [vmem:[%s1452_s9 + $0x118] sm:$0xff]  ;;  %v277_v54 = vld [vmem:[%s1452_s9 + $0x248] sm:$0xff] }
  0x87   : > { %389 = vmatmul.mubr.f32.gmra.mrb[2].mxu0 %v206_v55  ;;  %484 = vmatmul.mubr.f32.gmra.mrb[2].mxu1 %v244_v56  ;;  %v238_v55 = vld [vmem:[%s1452_s9 + $0x110] sm:$0xff]  ;;  %v276_v56 = vld [vmem:[%s1452_s9 + $0x240] sm:$0xff] }
  0x88   : > { %393 = vmatprep.mubr.f32.mxu0 %v209_v57  ;;  %488 = vmatprep.mubr.f32.mxu1 %v247_v58  ;;  %v241_v57 = vld [vmem:[%s1452_s9 + $0x128] sm:$0xff]  ;;  %v279_v58 = vld [vmem:[%s1452_s9 + $0x258] sm:$0xff] }
  0x8b   : > { %394 = vmatmul.mubr.f32.gmra.mrb[4].mxu0 %v208_v59  ;;  %489 = vmatmul.mubr.f32.gmra.mrb[4].mxu1 %v246_v60  ;;  %v240_v59 = vld [vmem:[%s1452_s9 + $0x120] sm:$0xff]  ;;  %v278_v60 = vld [vmem:[%s1452_s9 + $0x250] sm:$0xff]  ;;  %s1016_s9 = smul.u32 (%p1398_p8), 304, %s1377_s16 }
  0x8c   : > { %398 = vmatprep.mubr.f32.mxu0 %v211_v61  ;;  %493 = vmatprep.mubr.f32.mxu1 %v249_v62  ;;  %v1666_v61 = vld [vmem:[%s1938_s2] ss:$0 sm:$0xff] }
  0x8d   : > { %s1791_s26 = scalar_lea.vmem (%p1398_p8), %s1939_s3, %s1016_s9  }
  0x8f   : > { %399 = vmatmul.mubr.f32.gmra.mrb[6].mxu0 %v210_v63  ;;  %494 = vmatmul.mubr.f32.gmra.mrb[6].mxu1 %v248_v0 }
  0x90   : > { %403 = vmatprep.mubr.f32.mxu0 %v213_v1  ;;  %498 = vmatprep.mubr.f32.mxu1 %v251_v2 }
  0x93   : > { %404 = vmatmul.mubr.f32.gmra.mrb[8].mxu0 %v212_v3  ;;  %499 = vmatmul.mubr.f32.gmra.mrb[8].mxu1 %v250_v4 }
  0x94   : > { %408 = vmatprep.mubr.f32.mxu0 %v215_v5  ;;  %503 = vmatprep.mubr.f32.mxu1 %v253_v6 }
  0x97   : > { %409 = vmatmul.mubr.f32.gmra.mrb[10].mxu0 %v214_v7  ;;  %504 = vmatmul.mubr.f32.gmra.mrb[10].mxu1 %v252_v8 }
  0x98   : > { %413 = vmatprep.mubr.f32.mxu0 %v217_v9  ;;  %508 = vmatprep.mubr.f32.mxu1 %v255_v10 }
  0x9b   : > { %414 = vmatmul.mubr.f32.gmra.mrb[12].mxu0 %v216_v11  ;;  %509 = vmatmul.mubr.f32.gmra.mrb[12].mxu1 %v254_v12 }
  0x9c   : > { %418 = vmatprep.mubr.f32.mxu0 %v219_v13  ;;  %513 = vmatprep.mubr.f32.mxu1 %v257_v14 }
  0x9f   : > { %419 = vmatmul.mubr.f32.gmra.mrb[14].mxu0 %v218_v15  ;;  %514 = vmatmul.mubr.f32.gmra.mrb[14].mxu1 %v256_v16 }
  0xa0   : > { %423 = vmatprep.mubr.f32.mxu0 %v221_v17  ;;  %518 = vmatprep.mubr.f32.mxu1 %v259_v18 }
  0xa3   : > { %424 = vmatmul.mubr.f32.gmra.mrb[16].mxu0 %v220_v19  ;;  %519 = vmatmul.mubr.f32.gmra.mrb[16].mxu1 %v258_v20 }
  0xa4   : > { %428 = vmatprep.mubr.f32.mxu0 %v223_v21  ;;  %523 = vmatprep.mubr.f32.mxu1 %v261_v22 }
  0xa7   : > { %429 = vmatmul.mubr.f32.gmra.mrb[18].mxu0 %v222_v23  ;;  %524 = vmatmul.mubr.f32.gmra.mrb[18].mxu1 %v260_v24 }
  0xa8   : > { %433 = vmatprep.mubr.f32.mxu0 %v225_v25  ;;  %528 = vmatprep.mubr.f32.mxu1 %v263_v26 }
  0xab   : > { %434 = vmatmul.mubr.f32.gmra.mrb[20].mxu0 %v224_v27  ;;  %529 = vmatmul.mubr.f32.gmra.mrb[20].mxu1 %v262_v28 }
  0xac   : > { %438 = vmatprep.mubr.f32.mxu0 %v227_v29  ;;  %533 = vmatprep.mubr.f32.mxu1 %v265_v30 }
  0xaf   : > { %439 = vmatmul.mubr.f32.gmra.mrb[22].mxu0 %v226_v31  ;;  %534 = vmatmul.mubr.f32.gmra.mrb[22].mxu1 %v264_v32 }
  0xb0   : > { %443 = vmatprep.mubr.f32.mxu0 %v229_v33  ;;  %538 = vmatprep.mubr.f32.mxu1 %v267_v34 }
  0xb3   : > { %444 = vmatmul.mubr.f32.gmra.mrb[24].mxu0 %v228_v35  ;;  %539 = vmatmul.mubr.f32.gmra.mrb[24].mxu1 %v266_v36 }
  0xb4   : > { %448 = vmatprep.mubr.f32.mxu0 %v231_v37  ;;  %543 = vmatprep.mubr.f32.mxu1 %v269_v38 }
  0xb7   : > { %449 = vmatmul.mubr.f32.gmra.mrb[26].mxu0 %v230_v39  ;;  %544 = vmatmul.mubr.f32.gmra.mrb[26].mxu1 %v268_v40 }
  0xb8   : > { %453 = vmatprep.mubr.f32.mxu0 %v233_v41  ;;  %548 = vmatprep.mubr.f32.mxu1 %v271_v42 }
  0xbb   : > { %454 = vmatmul.mubr.f32.gmra.mrb[28].mxu0 %v232_v43  ;;  %549 = vmatmul.mubr.f32.gmra.mrb[28].mxu1 %v270_v44 }
  0xbc   : > { %458 = vmatprep.mubr.f32.mxu0 %v235_v45  ;;  %553 = vmatprep.mubr.f32.mxu1 %v273_v46 }
  0xbf   : > { %459 = vmatmul.mubr.f32.gmra.mrb[30].mxu0 %v234_v47  ;;  %554 = vmatmul.mubr.f32.gmra.mrb[30].mxu1 %v272_v48 }
  0xc0   : > { %463 = vmatprep.mubr.f32.mxu0 %v237_v49  ;;  %558 = vmatprep.mubr.f32.mxu1 %v275_v50 }
  0xc3   : > { %464 = vmatmul.mubr.f32.gmra.mrb[32].mxu0 %v236_v51  ;;  %559 = vmatmul.mubr.f32.gmra.mrb[32].mxu1 %v274_v52 }
  0xc4   : > { %468 = vmatprep.mubr.f32.mxu0 %v239_v53  ;;  %563 = vmatprep.mubr.f32.mxu1 %v277_v54 }
  0xc7   : > { %469 = vmatmul.mubr.f32.gmra.mrb[34].mxu0 %v238_v55  ;;  %564 = vmatmul.mubr.f32.gmra.mrb[34].mxu1 %v276_v56 }
  0xc8   : > { %473 = vmatprep.mubr.f32.mxu0 %v241_v57  ;;  %568 = vmatprep.mubr.f32.mxu1 %v279_v58 }
  0xcb   : > { %474 = vmatmul.mubr.f32.gmra.mrb[36].mxu0 %v240_v59  ;;  %569 = vmatmul.mubr.f32.gmra.mrb[36].mxu1 %v278_v60 }
 0x156   : > { %v385_v62 = vpop.f32.mrb[0].mxu0  ;;  %v480_v63 = vpop.f32.mrb[0].mxu1 }
 0x157   : > { %v386_v0 = vadd.f32 %v1666_v61, %v385_v62  ;;  %v481_v1 = vadd.f32 %v1666_v61, %v480_v63  ;;  %v387_v2 = vpop.f32.mrb[1].mxu0  ;;  %v482_v3 = vpop.f32.mrb[1].mxu1 }
 0x159   : > { %575 = vst.msk [vmem:[%s1670_s19] sm:$0xff] %vm574_vm0, %v386_v0  ;;  %594 = vst.msk [vmem:[%s1670_s19 + $0x98] sm:$0xff] %vm574_vm0, %v481_v1 }
 0x15a   : > { %v390_v4 = vpop.f32.mrb[2].mxu0  ;;  %v485_v5 = vpop.f32.mrb[2].mxu1 }
 0x15b   : > { %v391_v6 = vadd.f32 %v1666_v61, %v390_v4  ;;  %v486_v7 = vadd.f32 %v1666_v61, %v485_v5  ;;  %v392_v8 = vpop.f32.mrb[3].mxu0  ;;  %v487_v9 = vpop.f32.mrb[3].mxu1 }
 0x15d   : > { %576 = vst.msk [vmem:[%s1670_s19 + $0x8] sm:$0xff] %vm574_vm0, %v391_v6  ;;  %595 = vst.msk [vmem:[%s1670_s19 + $0xa0] sm:$0xff] %vm574_vm0, %v486_v7 }
 0x15e   : > { %v395_v10 = vpop.f32.mrb[4].mxu0  ;;  %v490_v11 = vpop.f32.mrb[4].mxu1 }
 0x15f   : > { %v396_v12 = vadd.f32 %v1666_v61, %v395_v10  ;;  %v491_v13 = vadd.f32 %v1666_v61, %v490_v11  ;;  %v397_v14 = vpop.f32.mrb[5].mxu0  ;;  %v492_v15 = vpop.f32.mrb[5].mxu1 }
 0x161   : > { %577 = vst.msk [vmem:[%s1670_s19 + $0x10] sm:$0xff] %vm574_vm0, %v396_v12  ;;  %596 = vst.msk [vmem:[%s1670_s19 + $0xa8] sm:$0xff] %vm574_vm0, %v491_v13 }
 0x162   : > { %v400_v16 = vpop.f32.mrb[6].mxu0  ;;  %v495_v17 = vpop.f32.mrb[6].mxu1 }
 0x163   : > { %v401_v18 = vadd.f32 %v1666_v61, %v400_v16  ;;  %v496_v19 = vadd.f32 %v1666_v61, %v495_v17  ;;  %v402_v20 = vpop.f32.mrb[7].mxu0  ;;  %v497_v21 = vpop.f32.mrb[7].mxu1 }
 0x165   : > { %578 = vst.msk [vmem:[%s1670_s19 + $0x18] sm:$0xff] %vm574_vm0, %v401_v18  ;;  %597 = vst.msk [vmem:[%s1670_s19 + $0xb0] sm:$0xff] %vm574_vm0, %v496_v19 }
 0x166   : > { %v405_v22 = vpop.f32.mrb[8].mxu0  ;;  %v500_v23 = vpop.f32.mrb[8].mxu1 }
 0x167   : > { %v406_v24 = vadd.f32 %v1666_v61, %v405_v22  ;;  %v501_v25 = vadd.f32 %v1666_v61, %v500_v23  ;;  %v407_v26 = vpop.f32.mrb[9].mxu0  ;;  %v502_v27 = vpop.f32.mrb[9].mxu1 }
 0x169   : > { %579 = vst.msk [vmem:[%s1670_s19 + $0x20] sm:$0xff] %vm574_vm0, %v406_v24  ;;  %598 = vst.msk [vmem:[%s1670_s19 + $0xb8] sm:$0xff] %vm574_vm0, %v501_v25 }
 0x16a   : > { %v410_v28 = vpop.f32.mrb[10].mxu0  ;;  %v505_v29 = vpop.f32.mrb[10].mxu1 }
 0x16b   : > { %v411_v30 = vadd.f32 %v1666_v61, %v410_v28  ;;  %v506_v31 = vadd.f32 %v1666_v61, %v505_v29  ;;  %v412_v32 = vpop.f32.mrb[11].mxu0  ;;  %v507_v33 = vpop.f32.mrb[11].mxu1 }
 0x16d   : > { %580 = vst.msk [vmem:[%s1670_s19 + $0x28] sm:$0xff] %vm574_vm0, %v411_v30  ;;  %599 = vst.msk [vmem:[%s1670_s19 + $0xc0] sm:$0xff] %vm574_vm0, %v506_v31 }
 0x16e   : > { %v415_v34 = vpop.f32.mrb[12].mxu0  ;;  %v510_v35 = vpop.f32.mrb[12].mxu1 }
 0x16f   : > { %v416_v36 = vadd.f32 %v1666_v61, %v415_v34  ;;  %v511_v37 = vadd.f32 %v1666_v61, %v510_v35  ;;  %v417_v38 = vpop.f32.mrb[13].mxu0  ;;  %v512_v39 = vpop.f32.mrb[13].mxu1 }
 0x171   : > { %581 = vst.msk [vmem:[%s1670_s19 + $0x30] sm:$0xff] %vm574_vm0, %v416_v36  ;;  %600 = vst.msk [vmem:[%s1670_s19 + $0xc8] sm:$0xff] %vm574_vm0, %v511_v37 }
 0x172   : > { %v420_v40 = vpop.f32.mrb[14].mxu0  ;;  %v515_v41 = vpop.f32.mrb[14].mxu1 }
 0x173   : > { %v421_v42 = vadd.f32 %v1666_v61, %v420_v40  ;;  %v516_v43 = vadd.f32 %v1666_v61, %v515_v41  ;;  %v422_v44 = vpop.f32.mrb[15].mxu0  ;;  %v517_v45 = vpop.f32.mrb[15].mxu1 }
 0x175   : > { %582 = vst.msk [vmem:[%s1670_s19 + $0x38] sm:$0xff] %vm574_vm0, %v421_v42  ;;  %601 = vst.msk [vmem:[%s1670_s19 + $0xd0] sm:$0xff] %vm574_vm0, %v516_v43 }
 0x176   : > { %v425_v46 = vpop.f32.mrb[16].mxu0  ;;  %v520_v47 = vpop.f32.mrb[16].mxu1 }
 0x177   : > { %v426_v48 = vadd.f32 %v1666_v61, %v425_v46  ;;  %v521_v49 = vadd.f32 %v1666_v61, %v520_v47  ;;  %v427_v50 = vpop.f32.mrb[17].mxu0  ;;  %v522_v51 = vpop.f32.mrb[17].mxu1 }
 0x179   : > { %583 = vst.msk [vmem:[%s1670_s19 + $0x40] sm:$0xff] %vm574_vm0, %v426_v48  ;;  %602 = vst.msk [vmem:[%s1670_s19 + $0xd8] sm:$0xff] %vm574_vm0, %v521_v49 }
 0x17a   : > { %v430_v52 = vpop.f32.mrb[18].mxu0  ;;  %v525_v53 = vpop.f32.mrb[18].mxu1 }
 0x17b   : > { %v431_v54 = vadd.f32 %v1666_v61, %v430_v52  ;;  %v526_v55 = vadd.f32 %v1666_v61, %v525_v53  ;;  %v432_v56 = vpop.f32.mrb[19].mxu0  ;;  %v527_v57 = vpop.f32.mrb[19].mxu1 }
 0x17d   : > { %584 = vst.msk [vmem:[%s1670_s19 + $0x48] sm:$0xff] %vm574_vm0, %v431_v54  ;;  %603 = vst.msk [vmem:[%s1670_s19 + $0xe0] sm:$0xff] %vm574_vm0, %v526_v55 }
 0x17e   : > { %v435_v58 = vpop.f32.mrb[20].mxu0  ;;  %v530_v59 = vpop.f32.mrb[20].mxu1 }
 0x17f   : > { %v436_v60 = vadd.f32 %v1666_v61, %v435_v58  ;;  %v531_v62 = vadd.f32 %v1666_v61, %v530_v59  ;;  %v437_v63 = vpop.f32.mrb[21].mxu0  ;;  %v532_v0 = vpop.f32.mrb[21].mxu1 }
 0x181   : > { %585 = vst.msk [vmem:[%s1670_s19 + $0x50] sm:$0xff] %vm574_vm0, %v436_v60  ;;  %604 = vst.msk [vmem:[%s1670_s19 + $0xe8] sm:$0xff] %vm574_vm0, %v531_v62 }
 0x182   : > { %v440_v1 = vpop.f32.mrb[22].mxu0  ;;  %v535_v2 = vpop.f32.mrb[22].mxu1 }
 0x183   : > { %v441_v3 = vadd.f32 %v1666_v61, %v440_v1  ;;  %v536_v4 = vadd.f32 %v1666_v61, %v535_v2  ;;  %v442_v5 = vpop.f32.mrb[23].mxu0  ;;  %v537_v6 = vpop.f32.mrb[23].mxu1 }
 0x185   : > { %586 = vst.msk [vmem:[%s1670_s19 + $0x58] sm:$0xff] %vm574_vm0, %v441_v3  ;;  %605 = vst.msk [vmem:[%s1670_s19 + $0xf0] sm:$0xff] %vm574_vm0, %v536_v4 }
 0x186   : > { %v445_v7 = vpop.f32.mrb[24].mxu0  ;;  %v540_v8 = vpop.f32.mrb[24].mxu1 }
 0x187   : > { %v446_v9 = vadd.f32 %v1666_v61, %v445_v7  ;;  %v541_v10 = vadd.f32 %v1666_v61, %v540_v8  ;;  %v447_v11 = vpop.f32.mrb[25].mxu0  ;;  %v542_v12 = vpop.f32.mrb[25].mxu1 }
 0x189   : > { %587 = vst.msk [vmem:[%s1670_s19 + $0x60] sm:$0xff] %vm574_vm0, %v446_v9  ;;  %606 = vst.msk [vmem:[%s1670_s19 + $0xf8] sm:$0xff] %vm574_vm0, %v541_v10 }
 0x18a   : > { %v450_v13 = vpop.f32.mrb[26].mxu0  ;;  %v545_v14 = vpop.f32.mrb[26].mxu1 }
 0x18b   : > { %v451_v15 = vadd.f32 %v1666_v61, %v450_v13  ;;  %v546_v16 = vadd.f32 %v1666_v61, %v545_v14  ;;  %v452_v17 = vpop.f32.mrb[27].mxu0  ;;  %v547_v18 = vpop.f32.mrb[27].mxu1 }
 0x18d   : > { %588 = vst.msk [vmem:[%s1670_s19 + $0x68] sm:$0xff] %vm574_vm0, %v451_v15  ;;  %607 = vst.msk [vmem:[%s1670_s19 + $0x100] sm:$0xff] %vm574_vm0, %v546_v16 }
 0x18e   : > { %v455_v19 = vpop.f32.mrb[28].mxu0  ;;  %v550_v20 = vpop.f32.mrb[28].mxu1 }
 0x18f   : > { %v456_v21 = vadd.f32 %v1666_v61, %v455_v19  ;;  %v551_v22 = vadd.f32 %v1666_v61, %v550_v20  ;;  %v457_v23 = vpop.f32.mrb[29].mxu0  ;;  %v552_v24 = vpop.f32.mrb[29].mxu1 }
 0x191   : > { %589 = vst.msk [vmem:[%s1670_s19 + $0x70] sm:$0xff] %vm574_vm0, %v456_v21  ;;  %608 = vst.msk [vmem:[%s1670_s19 + $0x108] sm:$0xff] %vm574_vm0, %v551_v22 }
 0x192   : > { %v460_v25 = vpop.f32.mrb[30].mxu0  ;;  %v555_v26 = vpop.f32.mrb[30].mxu1 }
 0x193   : > { %v461_v27 = vadd.f32 %v1666_v61, %v460_v25  ;;  %v556_v28 = vadd.f32 %v1666_v61, %v555_v26  ;;  %v462_v29 = vpop.f32.mrb[31].mxu0  ;;  %v557_v30 = vpop.f32.mrb[31].mxu1 }
 0x195   : > { %590 = vst.msk [vmem:[%s1670_s19 + $0x78] sm:$0xff] %vm574_vm0, %v461_v27  ;;  %609 = vst.msk [vmem:[%s1670_s19 + $0x110] sm:$0xff] %vm574_vm0, %v556_v28 }
 0x196   : > { %v465_v31 = vpop.f32.mrb[32].mxu0  ;;  %v560_v32 = vpop.f32.mrb[32].mxu1 }
 0x197   : > { %v466_v33 = vadd.f32 %v1666_v61, %v465_v31  ;;  %v561_v34 = vadd.f32 %v1666_v61, %v560_v32  ;;  %v467_v35 = vpop.f32.mrb[33].mxu0  ;;  %v562_v36 = vpop.f32.mrb[33].mxu1 }
 0x199   : > { %591 = vst.msk [vmem:[%s1670_s19 + $0x80] sm:$0xff] %vm574_vm0, %v466_v33  ;;  %610 = vst.msk [vmem:[%s1670_s19 + $0x118] sm:$0xff] %vm574_vm0, %v561_v34 }
 0x19a   : > { %v470_v37 = vpop.f32.mrb[34].mxu0  ;;  %v565_v38 = vpop.f32.mrb[34].mxu1 }
 0x19b   : > { %v471_v39 = vadd.f32 %v1666_v61, %v470_v37  ;;  %v566_v40 = vadd.f32 %v1666_v61, %v565_v38  ;;  %v472_v41 = vpop.f32.mrb[35].mxu0  ;;  %v567_v42 = vpop.f32.mrb[35].mxu1  ;;  %619 = sbr.rel (!%p1398_p8) target bundleno = 489 (0x1e9), region = 40 }
 0x19d   : > { %592 = vst.msk [vmem:[%s1670_s19 + $0x88] sm:$0xff] %vm574_vm0, %v471_v39  ;;  %611 = vst.msk [vmem:[%s1670_s19 + $0x120] sm:$0xff] %vm574_vm0, %v566_v40 }
 0x19e   : > { %v475_v43 = vpop.f32.mrb[36].mxu0  ;;  %v570_v44 = vpop.f32.mrb[36].mxu1 }
 0x19f   : > { %v476_v45 = vadd.f32 %v1666_v61, %v475_v43  ;;  %v571_v46 = vadd.f32 %v1666_v61, %v570_v44  ;;  %v477_v47 = vpop.f32.mrb[37].mxu0  ;;  %v572_v48 = vpop.f32.mrb[37].mxu1 }
 0x1a1   : > { %593 = vst.msk [vmem:[%s1670_s19 + $0x90] sm:$0xff] %vm574_vm0, %v476_v45  ;;  %612 = vst.msk [vmem:[%s1670_s19 + $0x128] sm:$0xff] %vm574_vm0, %v571_v46 }
 0x1a2   : > { %s1954_s23 = smov (!%p622_p7, %s621_s23), 38 }
 0x1a3   : > { %s1001_s28 = sshll.u32 %s1954_s23, 7 }
 0x1a4   : > { %p1004_p11 = scmp.eq.s32.totalorder %s1001_s28, 0 }
 0x1a5   : > { %1202 = sdivrem.u32 (!%p1004_p11), %s1954_s23, 38 }
 0x1a6   : > { %630 = sbr.rel (%p1004_p11) target bundleno = 489 (0x1e9), region = 44 }
 0x1ae   : > { %s1797_s22 = spop.drf %1202 }
 0x1af   : > { %p1005_p8 = scmp.le.s32.totalorder %s1797_s22, 0 }
 0x1b0   : > { %s1942_s16 = smov (!%p1005_p8), %s1791_s26  ;;  %s1943_s30 = smov (!%p1005_p8), %s1670_s19 }
 0x1b1   : > { %942 = sbr.rel (%p1005_p8) target bundleno = 460 (0x1cc), region = 126  ;;  %s1806_s6 = smov (!%p1005_p8), 0  }
 0x1b2   : > { %s1808_s7 = smov (!%p1005_p8), 0  }
 0x1b8 LB: >> { %v768_v61 = vld [vmem:[%s1308_s30] sm:$0xff]  ;;  %v770_v49 = vld [vmem:[%s1308_s30 + $0x8] sm:$0xff]  ;;  %v772_v50 = vld [vmem:[%s1308_s30 + $0x10] sm:$0xff]  ;;  %s844_s15 = sadd.s32 1, %s1312_s6  ;;  %s762_s7 = sadd.s32 1, %s1316_s7   ;;  %s1316_s7 = sphi %s1808_s7, %s762_s7   ;;  %s1312_s6 = sphi %s1806_s6, %s1946_s6   ;;  %s1308_s30 = sphi %s1943_s30, %s1945_s30   ;;  %s1304_s16 = sphi %s1942_s16, %s1944_s16  }
 0x1b9   : >> { %769 = vst [vmem:[%s1304_s16] sm:$0xff] %v768_v61  ;;  %771 = vst [vmem:[%s1304_s16 + $0x8] sm:$0xff] %v770_v49  ;;  %v774_v51 = vld [vmem:[%s1308_s30 + $0x18] sm:$0xff]  ;;  %v776_v52 = vld [vmem:[%s1308_s30 + $0x20] sm:$0xff]  ;;  %p845_p6 = scmp.ge.s32.totalorder %s844_s15, %s1797_s22  ;;  %p761_p9 = scmp.ge.s32.totalorder %s762_s7, %s1797_s22 }
 0x1ba   : >> { %773 = vst [vmem:[%s1304_s16 + $0x10] sm:$0xff] %v772_v50  ;;  %v778_v53 = vld [vmem:[%s1308_s30 + $0x28] sm:$0xff]  ;;  %775 = vst [vmem:[%s1304_s16 + $0x18] sm:$0xff] %v774_v51  ;;  %v780_v54 = vld [vmem:[%s1308_s30 + $0x30] sm:$0xff] }
 0x1bb   : >> { %777 = vst [vmem:[%s1304_s16 + $0x20] sm:$0xff] %v776_v52  ;;  %779 = vst [vmem:[%s1304_s16 + $0x28] sm:$0xff] %v778_v53  ;;  %v782_v55 = vld [vmem:[%s1308_s30 + $0x38] sm:$0xff]  ;;  %v784_v56 = vld [vmem:[%s1308_s30 + $0x40] sm:$0xff]  ;;  %s1956_s15 = smov (%p845_p6, %s844_s15), 0 }
 0x1bc   : >> { %781 = vst [vmem:[%s1304_s16 + $0x30] sm:$0xff] %v780_v54  ;;  %783 = vst [vmem:[%s1304_s16 + $0x38] sm:$0xff] %v782_v55  ;;  %v786_v57 = vld [vmem:[%s1308_s30 + $0x48] sm:$0xff]  ;;  %v788_v58 = vld [vmem:[%s1308_s30 + $0x50] sm:$0xff]  ;;  %s847_s27 = smul.u32 304, %s1956_s15  ;;  %s1946_s6 = smov %s1956_s15 }
 0x1bd   : >> { %785 = vst [vmem:[%s1304_s16 + $0x40] sm:$0xff] %v784_v56  ;;  %v790_v59 = vld [vmem:[%s1308_s30 + $0x58] sm:$0xff]  ;;  %787 = vst [vmem:[%s1304_s16 + $0x48] sm:$0xff] %v786_v57  ;;  %v792_v60 = vld [vmem:[%s1308_s30 + $0x60] sm:$0xff] }
 0x1be   : >> { %789 = vst [vmem:[%s1304_s16 + $0x50] sm:$0xff] %v788_v58  ;;  %791 = vst [vmem:[%s1304_s16 + $0x58] sm:$0xff] %v790_v59  ;;  %v794_v62 = vld [vmem:[%s1308_s30 + $0x68] sm:$0xff]  ;;  %v796_v63 = vld [vmem:[%s1308_s30 + $0x70] sm:$0xff]  ;;  %s1870_s29 = scalar_lea.vmem %s1670_s19, %s847_s27 [#allocation4]   ;;  %s1873_s5 = scalar_lea.vmem %s1791_s26, %s847_s27  }
 0x1bf   : >> { %793 = vst [vmem:[%s1304_s16 + $0x60] sm:$0xff] %v792_v60  ;;  %795 = vst [vmem:[%s1304_s16 + $0x68] sm:$0xff] %v794_v62  ;;  %v798_v0 = vld [vmem:[%s1308_s30 + $0x78] sm:$0xff]  ;;  %v800_v1 = vld [vmem:[%s1308_s30 + $0x80] sm:$0xff] }
 0x1c0   : >> { %797 = vst [vmem:[%s1304_s16 + $0x70] sm:$0xff] %v796_v63  ;;  %v802_v2 = vld [vmem:[%s1308_s30 + $0x88] sm:$0xff]  ;;  %799 = vst [vmem:[%s1304_s16 + $0x78] sm:$0xff] %v798_v0  ;;  %v804_v3 = vld [vmem:[%s1308_s30 + $0x90] sm:$0xff] }
 0x1c1   : >> { %801 = vst [vmem:[%s1304_s16 + $0x80] sm:$0xff] %v800_v1  ;;  %803 = vst [vmem:[%s1304_s16 + $0x88] sm:$0xff] %v802_v2  ;;  %v806_v4 = vld [vmem:[%s1308_s30 + $0x98] sm:$0xff]  ;;  %v808_v5 = vld [vmem:[%s1308_s30 + $0xa0] sm:$0xff] }
 0x1c2   : >> { %805 = vst [vmem:[%s1304_s16 + $0x90] sm:$0xff] %v804_v3  ;;  %807 = vst [vmem:[%s1304_s16 + $0x98] sm:$0xff] %v806_v4  ;;  %v810_v6 = vld [vmem:[%s1308_s30 + $0xa8] sm:$0xff]  ;;  %v812_v7 = vld [vmem:[%s1308_s30 + $0xb0] sm:$0xff] }
 0x1c3   : >> { %809 = vst [vmem:[%s1304_s16 + $0xa0] sm:$0xff] %v808_v5  ;;  %v814_v8 = vld [vmem:[%s1308_s30 + $0xb8] sm:$0xff]  ;;  %811 = vst [vmem:[%s1304_s16 + $0xa8] sm:$0xff] %v810_v6  ;;  %v816_v9 = vld [vmem:[%s1308_s30 + $0xc0] sm:$0xff] }
 0x1c4   : >> { %813 = vst [vmem:[%s1304_s16 + $0xb0] sm:$0xff] %v812_v7  ;;  %815 = vst [vmem:[%s1304_s16 + $0xb8] sm:$0xff] %v814_v8  ;;  %v818_v10 = vld [vmem:[%s1308_s30 + $0xc8] sm:$0xff]  ;;  %v820_v11 = vld [vmem:[%s1308_s30 + $0xd0] sm:$0xff] }
 0x1c5   : >> { %817 = vst [vmem:[%s1304_s16 + $0xc0] sm:$0xff] %v816_v9  ;;  %819 = vst [vmem:[%s1304_s16 + $0xc8] sm:$0xff] %v818_v10  ;;  %v822_v12 = vld [vmem:[%s1308_s30 + $0xd8] sm:$0xff]  ;;  %v824_v13 = vld [vmem:[%s1308_s30 + $0xe0] sm:$0xff]  ;;  %764 = sbr.rel (!%p761_p9) target bundleno = 440 (0x1b8), region = 132 }
 0x1c6   : >> { %821 = vst [vmem:[%s1304_s16 + $0xd0] sm:$0xff] %v820_v11  ;;  %v826_v14 = vld [vmem:[%s1308_s30 + $0xe8] sm:$0xff]  ;;  %823 = vst [vmem:[%s1304_s16 + $0xd8] sm:$0xff] %v822_v12  ;;  %v828_v15 = vld [vmem:[%s1308_s30 + $0xf0] sm:$0xff] }
 0x1c7   : >> { %825 = vst [vmem:[%s1304_s16 + $0xe0] sm:$0xff] %v824_v13  ;;  %827 = vst [vmem:[%s1304_s16 + $0xe8] sm:$0xff] %v826_v14  ;;  %v830_v16 = vld [vmem:[%s1308_s30 + $0xf8] sm:$0xff]  ;;  %v832_v17 = vld [vmem:[%s1308_s30 + $0x100] sm:$0xff] }
 0x1c8   : >> { %829 = vst [vmem:[%s1304_s16 + $0xf0] sm:$0xff] %v828_v15  ;;  %831 = vst [vmem:[%s1304_s16 + $0xf8] sm:$0xff] %v830_v16  ;;  %v834_v18 = vld [vmem:[%s1308_s30 + $0x108] sm:$0xff]  ;;  %v836_v19 = vld [vmem:[%s1308_s30 + $0x110] sm:$0xff] }
 0x1c9   : >> { %833 = vst [vmem:[%s1304_s16 + $0x100] sm:$0xff] %v832_v17  ;;  %v838_v20 = vld [vmem:[%s1308_s30 + $0x118] sm:$0xff]  ;;  %835 = vst [vmem:[%s1304_s16 + $0x108] sm:$0xff] %v834_v18  ;;  %v840_v21 = vld [vmem:[%s1308_s30 + $0x120] sm:$0xff] }
 0x1ca   : >> { %837 = vst [vmem:[%s1304_s16 + $0x110] sm:$0xff] %v836_v19  ;;  %839 = vst [vmem:[%s1304_s16 + $0x118] sm:$0xff] %v838_v20  ;;  %v842_v22 = vld [vmem:[%s1308_s30 + $0x128] sm:$0xff]  ;;  %s1945_s30 = smov %s1870_s29 }
 0x1cb   : >> { %841 = vst [vmem:[%s1304_s16 + $0x120] sm:$0xff] %v840_v21  ;;  %843 = vst [vmem:[%s1304_s16 + $0x128] sm:$0xff] %v842_v22  ;;  %s1944_s16 = smov %s1873_s5 }
 0x1cc PF: > { %1204 = sdivrem.u32 %s1954_s23, 38 }
 0x1cd   : > { %s1006_s8 = smul.u32 304, %s1797_s22 }
 0x1cf   : > { %s855_s10 = scalar_lea.vmem %s1670_s19, %s1006_s8 [#allocation4]   ;;  %s857_s21 = scalar_lea.vmem %s1791_s26, %s1006_s8  }
 0x1d5   : > { %s1205_s11 = spop.drf %1204 }
 0x1d6   : > { %p1008_p10 = scmp.le.s32.totalorder %s1205_s11, 0 }
 0x1d7   : > { %s1318_s12 = smov (!%p1008_p10), %s857_s21   ;;  %s1322_s18 = smov (!%p1008_p10), %s855_s10  }
 0x1d8   : > { %956 = sbr.rel (%p1008_p10) target bundleno = 489 (0x1e9), region = 137  ;;  %s1326_s4 = smov (!%p1008_p10), 0  }
 0x1d9   : > { %s1330_s9 = smov (!%p1008_p10), 0  }
 0x1df LB: >> { %v867_v23 = vld [vmem:[%s1324_s18] sm:$0xff]  ;;  %s869_s24 = sadd.s32 1, %s1328_s4  ;;  %s861_s9 = sadd.s32 1, %s1332_s9   ;;  %s1332_s9 = sphi %s1330_s9, %s861_s9   ;;  %s1328_s4 = sphi %s1326_s4, %s1327_s4   ;;  %s1324_s18 = sphi %s1322_s18, %s874_s18   ;;  %s1320_s12 = sphi %s1318_s12, %s875_s12  }
 0x1e0   : >> { %868 = vst [vmem:[%s1320_s12] sm:$0xff] %v867_v23  ;;  %p870_p12 = scmp.ge.s32.totalorder %s869_s24, %s1205_s11  ;;  %p860_p13 = scmp.ge.s32.totalorder %s861_s9, %s1205_s11 }
 0x1e2   : >> { %s1958_s24 = smov (%p870_p12, %s869_s24), 0  ;;  %863 = sbr.rel (!%p860_p13) target bundleno = 479 (0x1df), region = 143 }
 0x1e3   : >> { %s1009_s19 = sshll.u32 %s1958_s24, 3  ;;  %s1327_s4 = smov %s1958_s24  }
 0x1e4   : >> { %s874_s18 = scalar_lea.vmem %s855_s10, %s1009_s19 [#allocation4]   ;;  %s875_s12 = scalar_lea.vmem %s857_s21, %s1009_s19  }
 0x1e9 PF: > { %p13_p1 = scmp.ge.s32.totalorder %s1380_s17, 4   ;;  %s1947_s12 = smov %s1292_s13 }
 0x1ea   : > { %s1948_s13 = smov %s1296_s14  ;;  %s1949_s14 = smov %s1390_s20 }
 0x1eb   : > { %s1950_s15 = smov %s1380_s17  ;;  %15 = sbr.rel (!%p13_p1) target bundleno = 3 (0x3), region = 154 }
 0x1f2   :  { %891 = vsyncpa [#allocation3], 1 }
 0x1f3   :  { %893 = vsyncpa [#allocation3 + $0x1], 1 }

</bundles_post_ra>
